<compile_context>
chip_gen: v6e
topology: v6e:2x2x1
jax: 0.10.0
libtpu: 0.0.40
codegen_flags: <defaults>
</compile_context>

<pallas_src>
import jax
import jax.numpy as jnp
import numpy as np
from jax import lax
from jax.experimental import pallas as pl
from jax.experimental.pallas import tpu as pltpu


def _round_up(x, m):
    return ((x + m - 1) // m) * m


def _time_siren_kernel(x_ref, w1_ref, w2_ref, b2_ref, o_ref):
    # x_ref : (TB, input_dim)        -- streamed batch tile
    # w1_ref: (input_dim, emb_dim)   -- VMEM-resident, (in, out) orientation
    # w2_ref: (emb_dim, emb_dim)     -- VMEM-resident, (in, out) orientation
    # b2_ref: (1, emb_dim)
    # o_ref : (TB, emb_dim)          -- unpadded output tile
    x = x_ref[...].astype(jnp.float32)
    w1 = w1_ref[...].astype(jnp.float32)
    input_dim = x_ref.shape[1]

    if input_dim <= 8:
        # K is tiny: unrolled VPU broadcast-FMAs beat an MXU push + serial
        # result pop on the critical path before sin (v5e/v6e especially).
        acc = x[:, 0:1] * w1[0:1, :]
        for k in range(1, input_dim):
            acc = acc + x[:, k:k + 1] * w1[k:k + 1, :]
        h = jnp.sin(acc)
    else:
        h = jnp.sin(
            lax.dot_general(
                x, w1,
                dimension_numbers=(((1,), (0,)), ((), ())),
                preferred_element_type=jnp.float32,
            )
        )

    # out = h @ W2t + b2   (MXU-native (M,K)x(K,N), no transpose in-kernel)
    out = lax.dot_general(
        h, w2_ref[...],
        dimension_numbers=(((1,), (0,)), ((), ())),
        preferred_element_type=jnp.float32,
    ) + b2_ref[...]

    o_ref[...] = out.astype(o_ref.dtype)


def time_siren_forward(x, w1, w2, b2, *, block_rows=4096):
    """x: (B, input_dim); w1: (emb, input_dim); w2: (emb, emb); b2: (emb,)."""
    B, input_dim = x.shape
    emb_dim = w1.shape[0]

    # Pre-transpose weights to (in, out) once.  NOTE: in a real model cache
    # (w1t, w2t, b2r) across calls instead of rebuilding per forward.
    w1t = jnp.asarray(w1, x.dtype).T                       # (input_dim, emb)
    w2t = jnp.asarray(w2, x.dtype).T                       # (emb, emb)
    b2r = jnp.asarray(b2, x.dtype).reshape(1, emb_dim)     # (1, emb)

    # Batch tile: target >=2 grid steps (both TCs on v7x) but keep tiles big
    # (cap block_rows) so the ~0.35us/step grid overhead stays amortized.
    TB = min(block_rows, max(8, _round_up(pl.cdiv(B, 2), 8)))
    B_pad = _round_up(B, TB)
    if B_pad != B:
        x_in = jnp.zeros((B_pad, input_dim), x.dtype).at[:B, :].set(x)
    else:
        x_in = x

    grid = (B_pad // TB,)

    out = pl.pallas_call(
        _time_siren_kernel,
        out_shape=jax.ShapeDtypeStruct((B_pad, emb_dim), x.dtype),
        grid=grid,
        in_specs=[
            pl.BlockSpec((TB, input_dim), lambda i: (i, 0)),        # x tile
            pl.BlockSpec((input_dim, emb_dim), lambda i: (0, 0)),   # W1t resident
            pl.BlockSpec((emb_dim, emb_dim), lambda i: (0, 0)),     # W2t resident
            pl.BlockSpec((1, emb_dim), lambda i: (0, 0)),           # b2 resident
        ],
        out_specs=pl.BlockSpec((TB, emb_dim), lambda i: (i, 0)),
        compiler_params=pltpu.CompilerParams(
            dimension_semantics=("parallel",),  # 2 TCs on v7x; no-op on v5e/v6e
        ),
    )(x_in, w1t, w2t, b2r)

    return out[:B] if B_pad != B else out
    # TODO(synk): for bandwidth-critical deployments, carry x/out in bfloat16
    # (sin + accumulation stay f32) to halve HBM traffic if accuracy allows.


def init_time_siren_params(key, input_dim, emb_dim, dtype=jnp.float32):
    """Deterministic init mimicking PyTorch nn.Linear defaults
    (uniform(-1/sqrt(fan_in), 1/sqrt(fan_in)))."""
    k1, k2, k3 = jax.random.split(key, 3)
    bound1 = 1.0 / np.sqrt(input_dim)
    bound2 = 1.0 / np.sqrt(emb_dim)
    w1 = jax.random.uniform(k1, (emb_dim, input_dim), dtype, -bound1, bound1)
    w2 = jax.random.uniform(k2, (emb_dim, emb_dim), dtype, -bound2, bound2)
    b2 = jax.random.uniform(k3, (emb_dim,), dtype, -bound2, bound2)
    return w1, w2, b2


def time_siren_ref(x, w1, w2, b2):
    # Pure-JAX reference mirroring the PyTorch forward (f32 GEMMs).
    h = jnp.sin(jnp.dot(x, w1.T, precision=lax.Precision.HIGHEST))
    return jnp.dot(h, w2.T, precision=lax.Precision.HIGHEST) + b2


if __name__ == "__main__":
    batch, input_dim, emb_dim = 8, 4, 32

    key = jax.random.PRNGKey(0)
    kx, kp = jax.random.split(key)
    x = jax.random.normal(kx, (batch, input_dim), jnp.float32)
    w1, w2, b2 = init_time_siren_params(kp, input_dim, emb_dim)

    out = time_siren_forward(x, w1, w2, b2)
    out = jax.block_until_ready(out)

    ref = time_siren_ref(x, w1, w2, b2)
    np.testing.assert_allclose(np.asarray(out), np.asarray(ref),
                               rtol=1e-5, atol=1e-5)

    # Also exercise a batch that is not a multiple of the tile / sublane count
    # (forces batch padding and a 2-step grid).
    x2 = jax.random.normal(kx, (515, input_dim), jnp.float32)
    out2 = jax.block_until_ready(time_siren_forward(x2, w1, w2, b2))
    np.testing.assert_allclose(np.asarray(out2),
                               np.asarray(time_siren_ref(x2, w1, w2, b2)),
                               rtol=1e-5, atol=1e-5)

    print("KERNEL_OK")
</pallas_src>

<mosaic_0001>
module attributes {stable_mosaic.version = 11 : i64} {
  func.func @_time_siren_kernel(%arg0: i32, %arg1: memref<8x4xf32, #tpu.memory_space<vmem>>, %arg2: memref<4x32xf32, #tpu.memory_space<vmem>>, %arg3: memref<32x32xf32, #tpu.memory_space<vmem>>, %arg4: memref<1x32xf32, #tpu.memory_space<vmem>>, %arg5: memref<8x32xf32, #tpu.memory_space<vmem>>) attributes {dimension_semantics = [#tpu.dimension_semantics<parallel>], iteration_bounds = array<i64: 1>, scalar_prefetch = 0 : i64, scratch_operands = 0 : i64, tpu.core_type = #tpu.core_type<tc>, window_params = [{transform_indices = @transform_0, window_bounds = array<i64: 8, 4>}, {pipeline_mode = #tpu.pipeline_mode<synchronous>, transform_indices = @transform_1, window_bounds = array<i64: 4, 32>}, {pipeline_mode = #tpu.pipeline_mode<synchronous>, transform_indices = @transform_2, window_bounds = array<i64: 32, 32>}, {pipeline_mode = #tpu.pipeline_mode<synchronous>, transform_indices = @transform_3, window_bounds = array<i64: 1, 32>}, {transform_indices = @transform_4, window_bounds = array<i64: 8, 32>}]} {
    %c0 = arith.constant 0 : index
    %c0_0 = arith.constant 0 : index
    %0 = vector.load %arg1[%c0, %c0_0] : memref<8x4xf32, #tpu.memory_space<vmem>>, vector<8x4xf32>
    %c0_1 = arith.constant 0 : index
    %c0_2 = arith.constant 0 : index
    %1 = vector.load %arg2[%c0_1, %c0_2] : memref<4x32xf32, #tpu.memory_space<vmem>>, vector<4x32xf32>
    %2 = vector.extract_strided_slice %0 {offsets = [0, 0], sizes = [8, 1], strides = [1, 1]} : vector<8x4xf32> to vector<8x1xf32>
    %3 = vector.extract_strided_slice %1 {offsets = [0, 0], sizes = [1, 32], strides = [1, 1]} : vector<4x32xf32> to vector<1x32xf32>
    %4 = vector.broadcast %2 : vector<8x1xf32> to vector<8x32xf32>
    %5 = vector.broadcast %3 : vector<1x32xf32> to vector<8x32xf32>
    %6 = arith.mulf %4, %5 : vector<8x32xf32>
    %7 = vector.extract_strided_slice %0 {offsets = [0, 1], sizes = [8, 1], strides = [1, 1]} : vector<8x4xf32> to vector<8x1xf32>
    %8 = vector.extract_strided_slice %1 {offsets = [1, 0], sizes = [1, 32], strides = [1, 1]} : vector<4x32xf32> to vector<1x32xf32>
    %9 = vector.broadcast %7 : vector<8x1xf32> to vector<8x32xf32>
    %10 = vector.broadcast %8 : vector<1x32xf32> to vector<8x32xf32>
    %11 = arith.mulf %9, %10 : vector<8x32xf32>
    %12 = arith.addf %6, %11 : vector<8x32xf32>
    %13 = vector.extract_strided_slice %0 {offsets = [0, 2], sizes = [8, 1], strides = [1, 1]} : vector<8x4xf32> to vector<8x1xf32>
    %14 = vector.extract_strided_slice %1 {offsets = [2, 0], sizes = [1, 32], strides = [1, 1]} : vector<4x32xf32> to vector<1x32xf32>
    %15 = vector.broadcast %13 : vector<8x1xf32> to vector<8x32xf32>
    %16 = vector.broadcast %14 : vector<1x32xf32> to vector<8x32xf32>
    %17 = arith.mulf %15, %16 : vector<8x32xf32>
    %18 = arith.addf %12, %17 : vector<8x32xf32>
    %19 = vector.extract_strided_slice %0 {offsets = [0, 3], sizes = [8, 1], strides = [1, 1]} : vector<8x4xf32> to vector<8x1xf32>
    %20 = vector.extract_strided_slice %1 {offsets = [3, 0], sizes = [1, 32], strides = [1, 1]} : vector<4x32xf32> to vector<1x32xf32>
    %21 = vector.broadcast %19 : vector<8x1xf32> to vector<8x32xf32>
    %22 = vector.broadcast %20 : vector<1x32xf32> to vector<8x32xf32>
    %23 = arith.mulf %21, %22 : vector<8x32xf32>
    %24 = arith.addf %18, %23 : vector<8x32xf32>
    %25 = math.sin %24 : vector<8x32xf32>
    %c0_3 = arith.constant 0 : index
    %c0_4 = arith.constant 0 : index
    %26 = vector.load %arg3[%c0_3, %c0_4] : memref<32x32xf32, #tpu.memory_space<vmem>>, vector<32x32xf32>
    %cst = arith.constant dense<0.000000e+00> : vector<8x32xf32>
    %27 = tpu.matmul %25, %26, %cst {dimension_numbers = #tpu.dot_dimension_numbers<[1], [0], [0], [1], [0, 0, 1, 1], [], []>} : vector<8x32xf32>, vector<32x32xf32>, vector<8x32xf32> -> vector<8x32xf32>
    %c0_5 = arith.constant 0 : index
    %c0_6 = arith.constant 0 : index
    %28 = vector.load %arg4[%c0_5, %c0_6] : memref<1x32xf32, #tpu.memory_space<vmem>>, vector<1x32xf32>
    %29 = vector.broadcast %28 : vector<1x32xf32> to vector<8x32xf32>
    %30 = arith.addf %27, %29 : vector<8x32xf32>
    %c0_7 = arith.constant 0 : index
    %c0_8 = arith.constant 0 : index
    %31 = vector.load %arg5[%c0_7, %c0_8] : memref<8x32xf32, #tpu.memory_space<vmem>>, vector<8x32xf32>
    tpu.vector_store %arg5[%c0_7, %c0_8], %30 {strides = array<i32>} : memref<8x32xf32, #tpu.memory_space<vmem>>, vector<8x32xf32>,
    return
  }
  func.func @transform_0(%arg0: i32) -> (i32, i32) {
    %c0_i32 = arith.constant 0 : i32
    %c0_i32_0 = arith.constant 0 : i32
    return %arg0, %c0_i32 : i32, i32
  }
  func.func @transform_1(%arg0: i32) -> (i32, i32) {
    %c0_i32 = arith.constant 0 : i32
    %c0_i32_0 = arith.constant 0 : i32
    %c0_i32_1 = arith.constant 0 : i32
    return %c0_i32, %c0_i32_0 : i32, i32
  }
  func.func @transform_2(%arg0: i32) -> (i32, i32) {
    %c0_i32 = arith.constant 0 : i32
    %c0_i32_0 = arith.constant 0 : i32
    %c0_i32_1 = arith.constant 0 : i32
    return %c0_i32, %c0_i32_0 : i32, i32
  }
  func.func @transform_3(%arg0: i32) -> (i32, i32) {
    %c0_i32 = arith.constant 0 : i32
    %c0_i32_0 = arith.constant 0 : i32
    %c0_i32_1 = arith.constant 0 : i32
    return %c0_i32, %c0_i32_0 : i32, i32
  }
  func.func @transform_4(%arg0: i32) -> (i32, i32) {
    %c0_i32 = arith.constant 0 : i32
    %c0_i32_0 = arith.constant 0 : i32
    return %arg0, %c0_i32 : i32, i32
  }
}

</mosaic_0001>

<bundles_post_ra>
// kernel: tpu_custom_call.1
= control target key start
LH: loop header
LB: loop body
LE: loop exit
PB: predicated region body
PF: predicated region fallthrough
CT: control target
= control target key end

     0   :  { %9 = vsyncpa [#allocation3], 0  ;;  %s451_s0 = inlined_call_operand.vmem [shape: f32[8,4], index: 0, kind: input, shape index: {}]   ;;  %s452_s1 = inlined_call_operand.vmem [shape: f32[4,32], index: 1, kind: input, shape index: {}]   ;;  %s453_s2 = inlined_call_operand.hbm [shape: f32[32,32], index: 2, kind: input, shape index: {}]   ;;  %s454_s3 = inlined_call_operand.vmem [shape: f32[1,32], index: 3, kind: input, shape index: {}]   ;;  %s455_s4 = inlined_call_operand.hbm [shape: f32[8,32], index: 4, kind: output, shape index: {}]  }
   0x1   :  { %10 = vsyncpa [#allocation4], 0  ;;  %s374_s15 = smov [#allocation2]  }
   0x2   :  { %s20_s16 = sshll.u32 %s374_s15, 4  ;;  %s21_s16 = int_to_ptr.vmem [resolvable:$true] %s20_s16 }
   0x3   :  { %s338_s17 = scalar_lea.vmem %s21_s16, 512  ;;  %p343_p1 = scmp.lt.s32.totalorder %s21_s16, %s21_s16 }
   0x4   :  { %p339_p0 = scmp.ne.s32.totalorder %s21_s16, %s338_s17  ;;  %p344_p2 = scmp.lt.s32.totalorder %s338_s17, %s338_s17 }
   0x6   :  { %p345_p3 = por %p344_p2, %p343_p1 }
   0x8   :  { %p346_p4 = pnand %p345_p3, %p339_p0 }
   0xa   :  { %349 = shalt.err (!%p346_p4)
}
   0xb   :  { %s375_s18 = smov 128   ;;  %s376_s19 = smov 8  }
   0xc   :  { %26 = dma.hbm_to_vmem [thread:$0]  %s453_s2, 512, %s21_s16, [#allocation3], %s375_s18, %s375_s18, %s376_s19  }
   0xd   :  { %370 = dma.done.wait [#allocation3], 512  }
   0xe   :  { %371 = vsyncadd [#allocation3], 4294966784  ;;  %v377_v0 = vmov 0   ;;  %v378_v1 = vmov 2   ;;  %v32_v2 = vld [vmem:[%s451_s0] sm:$0xff]  ;;  %v379_v3 = vmov 1   ;;  %v39_v10 = vlaneseq }
   0xf   :  { %321 = vset.pattern.permute.xlu0 %v377_v0  ;;  %323 = vset.pattern.permute.xlu1 %v378_v1  ;;  %v380_v4 = vmov 3   ;;  %v181_v5 = vld [vmem:[#allocation2 + $0x18] sm:$0xff]  ;;  %v381_v6 = vmov 0.0   ;;  %v180_v7 = vld [vmem:[#allocation2 + $0x10] sm:$0xff]  ;;  %vm382_vm0 = vmmov 0   ;;  %v179_v8 = vld [vmem:[#allocation2 + $0x8] sm:$0xff] }
  0x10   :  { %36 = vperm.xlu0 %321, %v32_v2   ;;  %55 = vperm.xlu1 %323, %v32_v2   ;;  %v178_v9 = vld [vmem:[#allocation2] sm:$0xff]  ;;  %v40_v11 = vshrl.u32 %v39_v10, 7  ;;  %v383_v43 = vmov 2102212464   ;;  %v384_v45 = vmov 920167782  }
  0x11   :  { %290 = vmatprep.subr.mxu0 %v381_v6  ;;  %298 = vmatprep.mubr.msk.f32.mxu0 %vm382_vm0, %v381_v6  ;;  %v33_v14 = vld [vmem:[%s452_s1] sm:$0xf]  ;;  %v385_v49 = vmov 1326507024   ;;  %v386_v51 = vmov 683565275  }
  0x12   :  { %291 = vmatpush3.msra.mxu0 %v181_v5  ;;  %v41_v12 = vsub.s32 0, %v40_v11  ;;  %v50_v13 = vsub.s32 1, %v40_v11  ;;  %v60_v16 = vsub.s32 2, %v40_v11  ;;  %v70_v18 = vsub.s32 3, %v40_v11  ;;  %s389_s25 = smov [#allocation5]  }
  0x13   :  { %292 = vmatprep.subr.mxu0 %v381_v6  ;;  %v387_v53 = vmov 2475754826   ;;  %v388_v56 = vmov 2131351028   ;;  %vm189_vm13 = vcmask 261120   ;;  %s270_s26 = sshll.u32 %s389_s25, 4  ;;  %s271_s26 = int_to_ptr.vmem [resolvable:$true] %s270_s26 }
  0x14   :  { %322 = vset.pattern.permute.xlu0 %v379_v3  ;;  %324 = vset.pattern.permute.xlu1 %v380_v4  ;;  %v42_v19 = vrot.slane %v33_v14, %v41_v12  ;;  %v51_v20 = vrot.slane %v33_v14, %v50_v13  ;;  %v61_v21 = vrot.slane %v33_v14, %v60_v16  ;;  %s350_s27 = scalar_lea.vmem %s271_s26, 128  ;;  %p355_p6 = scmp.lt.s32.totalorder %s271_s26, %s271_s26 }
  0x15   :  { %45 = vperm.xlu0 %322, %v32_v2   ;;  %65 = vperm.xlu1 %324, %v32_v2   ;;  %v71_v22 = vrot.slane %v33_v14, %v70_v18  ;;  %p351_p5 = scmp.ne.s32.totalorder %s271_s26, %s350_s27  ;;  %p356_p7 = scmp.lt.s32.totalorder %s350_s27, %s350_s27 }
  0x16   :  { %293 = vmatpush3.msra.mxu0 %v180_v7 }
  0x17   :  { %294 = vmatprep.subr.mxu0 %v381_v6  ;;  %p357_p8 = por %p356_p7, %p355_p6 }
  0x18   :  { %295 = vmatpush3.msra.mxu0 %v179_v8 }
  0x19   :  { %325 = vset.pattern.permute.xlu0 %v380_v4  ;;  %296 = vmatprep.subr.mxu0 %v381_v6  ;;  %p358_p9 = pnand %p357_p8, %p351_p5 }
  0x1a   :  { %297 = vmatpush3.msra.mxu0 %v178_v9 }
  0x8b   :  { %v37_v15 = vpop.permute.xlu0 %36  ;;  %v56_v17 = vpop.permute.xlu1 %55 }
  0x8c   :  { %v43_v25 = vmul.f32 %v42_v19, %v37_v15  ;;  %v62_v27 = vmul.f32 %v61_v21, %v56_v17 }
  0x90   :  { %v46_v23 = vpop.permute.xlu0 %45  ;;  %v66_v24 = vpop.permute.xlu1 %65 }
  0x91   :  { %v52_v26 = vmul.f32 %v51_v20, %v46_v23  ;;  %v72_v29 = vmul.f32 %v71_v22, %v66_v24 }
  0x93   :  { %v53_v28 = vadd.f32 %v52_v26, %v43_v25 }
  0x95   :  { %v63_v30 = vadd.f32 %v62_v27, %v53_v28 }
  0x97   :  { %v424_v31 = vadd.f32 %v72_v29, %v63_v30 }
  0x99   :  { %v77_v32 = vand.u32 2139095040, %v424_v31  ;;  %v74_v33 = vand.u32 2147483647, %v424_v31  ;;  %vm76_vm8 = vcmp.lt.s32.totalorder %v424_v31, 0  ;;  %vm166_vm14 = vweird.f32 %v424_v31 }
  0x9b   :  { %v78_v34 = vshrl.u32 %v77_v32, 23  ;;  %v81_v36 = vand.u32 8388607, %v74_v33  ;;  %vm75_vm9 = vcmp.le.f32.partialorder %v74_v33, 0.7853982 }
  0x9d   :  { %v279_v35 = vadd.s32 4294967169, %v78_v34  ;;  %v82_v39 = vor.u32 8388608, %v81_v36 }
  0x9f   :  { %v84_v37 = vadd.s32 1, %v279_v35  ;;  %v122_v47 = vshll.u32 %v82_v39, 8 }
  0xa1   :  { %vm85_vm1 = vcmp.gt.s32.totalorder %v84_v37, 0 }
  0xa2   :  { %v86_v38 = vsel %vm85_vm1, %v84_v37, 0 }
  0xa3   :  { %v88_v40 = vand.u32 31, %v86_v38  ;;  %v87_v41 = vshrl.u32 %v86_v38, 5 }
  0xa5   :  { %v89_v42 = vsub.s32 32, %v88_v40  ;;  %v100_v44 = vshll.u32 %v383_v43, %v88_v40  ;;  %v103_v46 = vshll.u32 %v384_v45, %v88_v40  ;;  %v91_v52 = vshll.u32 %v386_v51, %v88_v40 }
  0xa6   :  { %v94_v55 = vshll.u32 %v387_v53, %v88_v40  ;;  %v97_v58 = vshll.u32 %v388_v56, %v88_v40  ;;  %vm109_vm2 = vcmp.lt.s32.totalorder %v87_v41, 4  ;;  %vm106_vm3 = vcmp.lt.s32.totalorder %v87_v41, 1 }
  0xa7   :  { %v101_v48 = vshrl.u32 %v384_v45, %v89_v42  ;;  %v104_v50 = vshrl.u32 %v385_v49, %v89_v42  ;;  %v92_v54 = vshrl.u32 %v387_v53, %v89_v42  ;;  %v95_v57 = vshrl.u32 %v388_v56, %v89_v42 }
  0xa8   :  { %v98_v59 = vshrl.u32 %v383_v43, %v89_v42  ;;  %v90_v63 = vshrl.u32 %v386_v51, %v89_v42  ;;  %vm107_vm4 = vcmp.lt.s32.totalorder %v87_v41, 2  ;;  %vm108_vm5 = vcmp.lt.s32.totalorder %v87_v41, 3 }
  0xa9   :  { %v102_v60 = vor.u32 %v101_v48, %v100_v44  ;;  %v105_v61 = vor.u32 %v104_v50, %v103_v46  ;;  %v93_v62 = vor.u32 %v92_v54, %v91_v52  ;;  %v96_v0 = vor.u32 %v95_v57, %v94_v55 }
  0xaa   :  { %v99_v1 = vor.u32 %v98_v59, %v97_v58 }
  0xab   :  { %v115_v2 = vsel %vm109_vm2, %v102_v60, 920167782  ;;  %v119_v3 = vsel %vm109_vm2, %v105_v61, 1326507024  ;;  %v114_v5 = vsel %vm106_vm3, %v93_v62, %v96_v0  ;;  %v110_v8 = vsel %vm106_vm3, %v90_v63, %v93_v62 }
  0xac   :  { %v111_v4 = vsel %vm109_vm2, %v99_v1, 2102212464  ;;  %v116_v6 = vsel %vm108_vm5, %v99_v1, %v115_v2  ;;  %v118_v7 = vsel %vm106_vm3, %v96_v0, %v99_v1  ;;  %v120_v11 = vsel %vm108_vm5, %v102_v60, %v119_v3  ;;  %v283_v60 = vld [vmem:[%s454_s3] ss:$0 sm:$0xff] }
  0xad   :  { %v112_v9 = vsel %vm108_vm5, %v96_v0, %v111_v4  ;;  %v117_v10 = vsel %vm107_vm4, %v114_v5, %v116_v6  ;;  %v121_v12 = vsel %vm107_vm4, %v118_v7, %v120_v11 }
  0xae   :  { %v430_v13 = vmul.u32.u64.low %v122_v47, %v117_v10  ;;  %v431_v14 = vmul.u32.u64.high %v122_v47, %v117_v10, %v430_v13  ;;  %v433_v15 = vmul.u32.u64.low %v122_v47, %v121_v12  ;;  %v434_v16 = vmul.u32.u64.high %v122_v47, %v121_v12, %v433_v15 }
  0xaf   :  { %v113_v17 = vsel %vm107_vm4, %v110_v8, %v112_v9 }
  0xb0   :  { %v132_v18 = vadd.s32 1, %v431_v14  ;;  %v129_v19 = vmul.u32 %v122_v47, %v113_v17  ;;  %vm131_vm6 = vc.u32 %v434_v16, %v430_v13  ;;  %v130_v32 = vadd.s32 %v430_v13, %v434_v16 }
  0xb2   :  { %v133_v20 = vsel %vm131_vm6, %v132_v18, %v431_v14 }
  0xb3   :  { %v134_v21 = vadd.s32 %v133_v20, %v129_v19 }
  0xb5   :  { %v135_v22 = vadd.s32 536870912, %v134_v21 }
  0xb7   :  { %v136_v23 = vshrl.u32 %v135_v22, 30 }
  0xb9   :  { %v137_v24 = vshll.u32 %v136_v23, 30  ;;  %v160_v46 = vsub.s32 4, %v136_v23 }
  0xbb   :  { %v138_v25 = vsub.s32 %v134_v21, %v137_v24  ;;  %v161_v49 = vsel %vm76_vm8, %v160_v46, %v136_v23 }
  0xbc   :  { %v163_v50 = vsel %vm75_vm9, 0, %v161_v49 }
  0xbd   :  { %v140_v26 = vsub.s32 0, %v138_v25  ;;  %v167_v51 = vadd.s32 3, %v163_v50 }
  0xbf   :  { %v280_v27 = vmin.u32 %v140_v26, %v138_v25  ;;  %v168_v52 = vand.u32 3, %v167_v51 }
  0xc1   :  { %v142_v28 = vclz %v280_v27  ;;  %vm173_vm10 = vcmp.eq.s32.totalorder %v168_v52, 2  ;;  %vm170_vm11 = vcmp.eq.s32.totalorder %v168_v52, 0  ;;  %vm169_vm12 = vcmp.lt.s32.totalorder %v168_v52, 2 }
  0xc3   :  { %v281_v29 = vadd.s32 4294967294, %v142_v28 }
  0xc5   :  { %vm282_vm7 = vcmp.lt.s32.totalorder %v281_v29, 0 }
  0xc6   :  { %v145_v30 = vsel %vm282_vm7, 0, %v281_v29 }
  0xc7   :  { %v146_v34 = vsub.s32 32, %v145_v30  ;;  %v150_v35 = vsub.s32 4294967266, %v145_v30  ;;  %v147_v36 = vshll.u32 %v138_v25, %v145_v30 }
  0xc9   :  { %v148_v37 = vshrl.u32 %v130_v32, %v146_v34  ;;  %v151_v38 = vadd.s32 127, %v150_v35 }
  0xcb   :  { %v149_v39 = vor.u32 %v148_v37, %v147_v36  ;;  %v152_v40 = vshll.u32 %v151_v38, 23 }
  0xcd   :  { %v153_v41 = vor.u32 4788187, %v152_v40  ;;  %v156_v43 = vcvt.s32.f32 %v149_v39 }
  0xcf   :  { %v154_v42 = vand.u32 2147483647, %v153_v41 }
  0xd1   :  { %v157_v44 = vmul.f32 %v156_v43, %v154_v42 }
  0xd3   :  { %v158_v45 = vxor.u32 2147483648, %v157_v44 }
  0xd5   :  { %v159_v47 = vsel %vm76_vm8, %v158_v45, %v157_v44 }
  0xd6   :  { %v162_v48 = vsel %vm75_vm9, %v424_v31, %v159_v47 }
  0xd7   :  { %326 = vcosq.f32 %v162_v48 }
  0xd8   :  { %328 = vsinq.f32 %v162_v48 }
  0xe4   :  { %v327_v53 = vpop.eup %326 }
  0xe5   :  { %v329_v54 = vpop.eup %328  ;;  %v174_v55 = vxor.u32 2147483648, %v327_v53 }
  0xe6   :  { %v171_v56 = vxor.u32 2147483648, %v329_v54 }
  0xe7   :  { %v175_v57 = vsel %vm173_vm10, %v174_v55, %v329_v54 }
  0xe8   :  { %v172_v58 = vsel %vm170_vm11, %v327_v53, %v171_v56 }
  0xe9   :  { %v176_v33 = vsel %vm169_vm12, %v172_v58, %v175_v57 }
  0xea   :  { %v177_v59 = vsel %vm166_vm14, nan, %v176_v33 }
  0xeb   :  { %299 = vmatmul.mubr.msk.f32.vlgmr.msra.gmra.mxu0 %vm189_vm13, %v177_v59 }
 0x1ab   :  { %v259_v61 = vpop.f32.mrf.mxu0 }
 0x1ac   :  { %v260_v62 = vadd.f32 %v283_v60, %v259_v61 }
 0x1ad   :  { %v300_v63 = vpop.f32.mrf.mxu0 }
 0x1ae   :  { %263 = vst.msk [vmem:[#allocation5] sm:$0xff] %vm189_vm13, %v260_v62 }
 0x1af   :  { %361 = shalt.err (!%p358_p9)
}
 0x1b0   :  { %273 = dma.vmem_to_hbm [thread:$0]  %s271_s26, 128, %s455_s4, [#allocation4]  }
 0x1b1   :  { %372 = dma.done.wait [#allocation4], 128  }
 0x1b2   :  { %373 = vsyncadd [#allocation4], 4294967168 }
 0x1b3   :  { %277 = vsyncpa [#allocation3], 1 }
 0x1b4   :  { %278 = vsyncpa [#allocation4], 1 }

</bundles_post_ra>
